<compile_context>
chip_gen: v5e
topology: v5e:2x2
jax: 0.10.0
libtpu: 0.0.40
codegen_flags: <defaults>
</compile_context>

<pallas_src>
import jax
import jax.numpy as jnp
from jax.experimental import pallas as pl
from jax.experimental.pallas import tpu as pltpu


def _round_up(x, m):
    return ((x + m - 1) // m) * m


def _mish(h):
    # mish(x) = x * tanh(softplus(x)) = x * ((1+e^x)^2 - 1) / ((1+e^x)^2 + 1)
    # One exp + one reciprocal on the EUP instead of exp + log1p + tanh.
    e = jnp.exp(jnp.minimum(h, 20.0))   # for x > 20 the ratio is exactly 1 in f32
    num = e * (e + 2.0)                  # (1+e)^2 - 1, no cancellation
    den = num + 2.0                      # (1+e)^2 + 1  (>= 2, never tiny)
    r = pl.reciprocal(den, approx=True)
    r = r * (2.0 - den * r)              # one Newton step -> ~f32 accuracy
    return h * (num * r)


def mlp_tokenizer_kernel(x_ref, w0_ref, b0_ref, w1_ref, b1_ref, o_ref):
    # fc_0: (TM, dt) @ (dt, dh) + b0
    h = jnp.dot(x_ref[...], w0_ref[...], preferred_element_type=jnp.float32)
    h = h + b0_ref[...]                  # (1, dh) broadcasts over rows
    h = _mish(h)
    # Dropout: eval-mode identity (deterministic forward).
    # TODO(synk): train-mode dropout would use pltpu.prng_seed / prng_random_bits.
    # fc_1: (TM, dh) @ (dh, dm) + b1
    out = jnp.dot(h, w1_ref[...], preferred_element_type=jnp.float32)
    out = out + b1_ref[...]
    o_ref[...] = out.astype(o_ref.dtype)


def mlp_tokenizer_v2(x, w0, b0, w1, b1, *, block_rows=2048):
    """x: (B, S, d_token) f32.  w0: (d_token, d_hidden), b0: (d_hidden,),
    w1: (d_hidden, d_model), b1: (d_model,).  Returns (B, S, d_model)."""
    B, S, d_token = x.shape
    d_hidden = w0.shape[1]
    d_model = w1.shape[1]
    N = B * S

    # ---- lane packing: p consecutive tokens per 128-lane row ---------------
    # Free row-major reshape of x; block-diagonal weights (kron with eye(p))
    # keep the math bit-identical in f32 while filling the MXU contraction.
    p = 1
    for cand in (4, 2):
        if N % cand == 0 and cand * d_token <= 512:
            p = cand
            break
    Np = N // p
    dt_p, dh_p, dm_p = p * d_token, p * d_hidden, p * d_model

    x2 = x.reshape(Np, dt_p)                             # free reshape
    if p > 1:
        eye = jnp.eye(p, dtype=w0.dtype)
        w0_p = jnp.kron(eye, w0)                         # (p*dt, p*dh) block-diag
        w1_p = jnp.kron(eye, w1)                         # (p*dh, p*dm) block-diag
        b0_p = jnp.tile(b0, p).reshape(1, dh_p)
        b1_p = jnp.tile(b1, p).reshape(1, dm_p)
    else:
        w0_p, w1_p = w0, w1
        b0_p, b1_p = b0.reshape(1, dh_p), b1.reshape(1, dm_p)

    # ---- row-tile selection -------------------------------------------------
    # Target ~4 grid steps: enough DMA/compute overlap on single-TC chips and
    # an even count for v7x megacore, without 8+ x the ~0.35us/step overhead.
    # For large N the tile caps at block_rows packed rows (~1 MiB x-tile,
    # ~4 MiB out-tile at 2048) so double-buffered tiles stay far below VMEM.
    target_steps = 4
    tm = min(block_rows, _round_up(pl.cdiv(Np, target_steps), 8))
    if Np < tm:
        tm = Np                      # full-extent block: always a legal shape
    grid = pl.cdiv(Np, tm)
    # v7x megacore: nudge small odd grids to an even step count (balance 2 TCs).
    if grid > 2 and grid % 2 == 1:
        tm_alt = min(block_rows, _round_up(pl.cdiv(Np, grid - 1), 8))
        if pl.cdiv(Np, tm_alt) % 2 == 0:
            tm = tm_alt
            grid = pl.cdiv(Np, tm)

    out2 = pl.pallas_call(
        mlp_tokenizer_kernel,
        out_shape=jax.ShapeDtypeStruct((Np, dm_p), x.dtype),
        grid_spec=pltpu.PrefetchScalarGridSpec(
            num_scalar_prefetch=0,
            grid=(grid,),
            in_specs=[
                pl.BlockSpec((tm, dt_p), lambda i: (i, 0)),
                # Constant-index weight/bias blocks: the pipeliner sees the
                # block index never changes and does not re-DMA them per step.
                pl.BlockSpec((dt_p, dh_p), lambda i: (0, 0)),
                pl.BlockSpec((1, dh_p), lambda i: (0, 0)),
                pl.BlockSpec((dh_p, dm_p), lambda i: (0, 0)),
                pl.BlockSpec((1, dm_p), lambda i: (0, 0)),
            ],
            # Lane-dense output tile (dm_p is a multiple of 128 -> full vst).
            out_specs=pl.BlockSpec((tm, dm_p), lambda i: (i, 0)),
        ),
        compiler_params=pltpu.CompilerParams(
            dimension_semantics=("parallel",),
            # ~15 MiB of double-buffered tiles at tm=2048; 48 MiB cap leaves
            # 16 MiB headroom on v7x's 64 MiB physical VMEM.
            vmem_limit_bytes=48 * 1024 * 1024,
        ),
    )(x2, w0_p, b0_p, w1_p, b1_p)

    return out2.reshape(B, S, d_model)     # free reshape (unpacks the lanes)


def _reference(x, w0, b0, w1, b1):
    h = x @ w0 + b0
    h = h * jnp.tanh(jax.nn.softplus(h))
    return h @ w1 + b1


if __name__ == "__main__":
    # Small shapes consistent with the module.
    B, S = 2, 8
    d_token, d_hidden, d_model = 32, 64, 128
    drop_out = 0.1  # unused in eval-mode forward

    key = jax.random.PRNGKey(0)
    k_x, k_w0, k_b0, k_w1, k_b1 = jax.random.split(key, 5)

    x = jax.random.normal(k_x, (B, S, d_token), dtype=jnp.float32)

    # Deterministic param init mimicking nn.Linear defaults: U(-1/sqrt(fan_in), +).
    # PyTorch weight is (out, in); store pre-transposed as (in, out) for the kernel.
    lim0 = 1.0 / jnp.sqrt(d_token)
    lim1 = 1.0 / jnp.sqrt(d_hidden)
    w0 = jax.random.uniform(k_w0, (d_token, d_hidden), jnp.float32, -lim0, lim0)
    b0 = jax.random.uniform(k_b0, (d_hidden,), jnp.float32, -lim0, lim0)
    w1 = jax.random.uniform(k_w1, (d_hidden, d_model), jnp.float32, -lim1, lim1)
    b1 = jax.random.uniform(k_b1, (d_model,), jnp.float32, -lim1, lim1)

    out = mlp_tokenizer_v2(x, w0, b0, w1, b1)
    out = jax.block_until_ready(out)

    ref = _reference(x, w0, b0, w1, b1)
    assert out.shape == (B, S, d_model)
    assert jnp.allclose(out, ref, atol=1e-4, rtol=1e-4), "mismatch vs reference"

    print("KERNEL_OK")
</pallas_src>

<mosaic_0001>
module attributes {stable_mosaic.version = 11 : i64} {
  func.func @mlp_tokenizer_kernel(%arg0: i32, %arg1: memref<4x128xf32, #tpu.memory_space<vmem>>, %arg2: memref<128x256xf32, #tpu.memory_space<vmem>>, %arg3: memref<1x256xf32, #tpu.memory_space<vmem>>, %arg4: memref<256x512xf32, #tpu.memory_space<vmem>>, %arg5: memref<1x512xf32, #tpu.memory_space<vmem>>, %arg6: memref<4x512xf32, #tpu.memory_space<vmem>>) attributes {dimension_semantics = [#tpu.dimension_semantics<parallel>], iteration_bounds = array<i64: 1>, scalar_prefetch = 0 : i64, scratch_operands = 0 : i64, tpu.core_type = #tpu.core_type<tc>, window_params = [{transform_indices = @transform_0, window_bounds = array<i64: 4, 128>}, {pipeline_mode = #tpu.pipeline_mode<synchronous>, transform_indices = @transform_1, window_bounds = array<i64: 128, 256>}, {pipeline_mode = #tpu.pipeline_mode<synchronous>, transform_indices = @transform_2, window_bounds = array<i64: 1, 256>}, {pipeline_mode = #tpu.pipeline_mode<synchronous>, transform_indices = @transform_3, window_bounds = array<i64: 256, 512>}, {pipeline_mode = #tpu.pipeline_mode<synchronous>, transform_indices = @transform_4, window_bounds = array<i64: 1, 512>}, {transform_indices = @transform_5, window_bounds = array<i64: 4, 512>}]} {
    %c0 = arith.constant 0 : index
    %c0_0 = arith.constant 0 : index
    %0 = vector.load %arg1[%c0, %c0_0] : memref<4x128xf32, #tpu.memory_space<vmem>>, vector<4x128xf32>
    %c0_1 = arith.constant 0 : index
    %c0_2 = arith.constant 0 : index
    %1 = vector.load %arg2[%c0_1, %c0_2] : memref<128x256xf32, #tpu.memory_space<vmem>>, vector<128x256xf32>
    %cst = arith.constant dense<0.000000e+00> : vector<4x256xf32>
    %2 = tpu.matmul %0, %1, %cst {dimension_numbers = #tpu.dot_dimension_numbers<[1], [0], [0], [1], [0, 0, 1, 1], [], []>} : vector<4x128xf32>, vector<128x256xf32>, vector<4x256xf32> -> vector<4x256xf32>
    %c0_3 = arith.constant 0 : index
    %c0_4 = arith.constant 0 : index
    %3 = vector.load %arg3[%c0_3, %c0_4] : memref<1x256xf32, #tpu.memory_space<vmem>>, vector<1x256xf32>
    %4 = vector.broadcast %3 : vector<1x256xf32> to vector<4x256xf32>
    %5 = arith.addf %2, %4 : vector<4x256xf32>
    %cst_5 = arith.constant 2.000000e+01 : f32
    %6 = vector.broadcast %cst_5 : f32 to vector<4x256xf32>
    %7 = arith.minimumf %5, %6 : vector<4x256xf32>
    %8 = math.exp %7 : vector<4x256xf32>
    %cst_6 = arith.constant 2.000000e+00 : f32
    %9 = vector.broadcast %cst_6 : f32 to vector<4x256xf32>
    %10 = arith.addf %8, %9 : vector<4x256xf32>
    %11 = arith.mulf %8, %10 : vector<4x256xf32>
    %cst_7 = arith.constant 2.000000e+00 : f32
    %12 = vector.broadcast %cst_7 : f32 to vector<4x256xf32>
    %13 = arith.addf %11, %12 : vector<4x256xf32>
    %14 = tpu.reciprocal %13 {approx = true} : vector<4x256xf32> -> vector<4x256xf32>
    %15 = arith.mulf %13, %14 : vector<4x256xf32>
    %cst_8 = arith.constant 2.000000e+00 : f32
    %16 = vector.broadcast %cst_8 : f32 to vector<4x256xf32>
    %17 = arith.subf %16, %15 : vector<4x256xf32>
    %18 = arith.mulf %14, %17 : vector<4x256xf32>
    %19 = arith.mulf %11, %18 : vector<4x256xf32>
    %20 = arith.mulf %5, %19 : vector<4x256xf32>
    %c0_9 = arith.constant 0 : index
    %c0_10 = arith.constant 0 : index
    %21 = vector.load %arg4[%c0_9, %c0_10] : memref<256x512xf32, #tpu.memory_space<vmem>>, vector<256x512xf32>
    %cst_11 = arith.constant dense<0.000000e+00> : vector<4x512xf32>
    %22 = tpu.matmul %20, %21, %cst_11 {dimension_numbers = #tpu.dot_dimension_numbers<[1], [0], [0], [1], [0, 0, 1, 1], [], []>} : vector<4x256xf32>, vector<256x512xf32>, vector<4x512xf32> -> vector<4x512xf32>
    %c0_12 = arith.constant 0 : index
    %c0_13 = arith.constant 0 : index
    %23 = vector.load %arg5[%c0_12, %c0_13] : memref<1x512xf32, #tpu.memory_space<vmem>>, vector<1x512xf32>
    %24 = vector.broadcast %23 : vector<1x512xf32> to vector<4x512xf32>
    %25 = arith.addf %22, %24 : vector<4x512xf32>
    %c0_14 = arith.constant 0 : index
    %c0_15 = arith.constant 0 : index
    %26 = vector.load %arg6[%c0_14, %c0_15] : memref<4x512xf32, #tpu.memory_space<vmem>>, vector<4x512xf32>
    tpu.vector_store %arg6[%c0_14, %c0_15], %25 {strides = array<i32>} : memref<4x512xf32, #tpu.memory_space<vmem>>, vector<4x512xf32>,
    return
  }
  func.func @transform_0(%arg0: i32) -> (i32, i32) {
    %c0_i32 = arith.constant 0 : i32
    %c0_i32_0 = arith.constant 0 : i32
    return %arg0, %c0_i32 : i32, i32
  }
  func.func @transform_1(%arg0: i32) -> (i32, i32) {
    %c0_i32 = arith.constant 0 : i32
    %c0_i32_0 = arith.constant 0 : i32
    %c0_i32_1 = arith.constant 0 : i32
    return %c0_i32, %c0_i32_0 : i32, i32
  }
  func.func @transform_2(%arg0: i32) -> (i32, i32) {
    %c0_i32 = arith.constant 0 : i32
    %c0_i32_0 = arith.constant 0 : i32
    %c0_i32_1 = arith.constant 0 : i32
    return %c0_i32, %c0_i32_0 : i32, i32
  }
  func.func @transform_3(%arg0: i32) -> (i32, i32) {
    %c0_i32 = arith.constant 0 : i32
    %c0_i32_0 = arith.constant 0 : i32
    %c0_i32_1 = arith.constant 0 : i32
    return %c0_i32, %c0_i32_0 : i32, i32
  }
  func.func @transform_4(%arg0: i32) -> (i32, i32) {
    %c0_i32 = arith.constant 0 : i32
    %c0_i32_0 = arith.constant 0 : i32
    %c0_i32_1 = arith.constant 0 : i32
    return %c0_i32, %c0_i32_0 : i32, i32
  }
  func.func @transform_5(%arg0: i32) -> (i32, i32) {
    %c0_i32 = arith.constant 0 : i32
    %c0_i32_0 = arith.constant 0 : i32
    return %arg0, %c0_i32 : i32, i32
  }
}

</mosaic_0001>

<bundles_post_ra>
// kernel: tpu_custom_call.1
= control target key start
LH: loop header
LB: loop body
LE: loop exit
PB: predicated region body
PF: predicated region fallthrough
CT: control target
= control target key end

     0   :  { %10 = vsyncpa [#allocation3], 0  ;;  %s764_s0 = inlined_call_operand.hbm [shape: f32[4,128], index: 0, kind: input, shape index: {}]   ;;  %s765_s1 = inlined_call_operand.hbm [shape: f32[128,256], index: 1, kind: input, shape index: {}]   ;;  %s766_s2 = inlined_call_operand.hbm [shape: f32[1,256], index: 2, kind: input, shape index: {}]   ;;  %s767_s3 = inlined_call_operand.hbm [shape: f32[256,512], index: 3, kind: input, shape index: {}]   ;;  %s768_s4 = inlined_call_operand.hbm [shape: f32[1,512], index: 4, kind: input, shape index: {}]   ;;  %s769_s5 = inlined_call_operand.hbm [shape: f32[4,512], index: 5, kind: output, shape index: {}]  }
   0x1   :  { %11 = vsyncpa [#allocation6], 0 }
   0x2   :  { %12 = vsyncpa [#allocation9], 0  ;;  %s29_s20 = sshll.u32 %s765_s1, 4  ;;  %s30_s20 = int_to_ptr.hbm [resolvable:$true] %s29_s20 }
   0x3   :  { %13 = vsyncpa [#allocation4], 0  ;;  %s696_s21 = smov [#allocation5]   ;;  %s53_s25 = sshll.u32 %s767_s3, 4  ;;  %s54_s25 = int_to_ptr.hbm [resolvable:$true] %s53_s25 }
   0x4   :  { %s31_s22 = sshll.u32 %s696_s21, 4  ;;  %s697_s26 = smov 256   ;;  %s32_s22 = int_to_ptr.vmem [resolvable:$true] %s31_s22 }
   0x5   :  { %s698_s27 = smov 16   ;;  %s699_s28 = smov [#allocation8]  }
   0x6   :  { %37 = dma.hbm_to_vmem [thread:$0]  %s30_s20, 4096, %s32_s22, [#allocation6], %s697_s26, %s697_s26, %s698_s27  }
   0x7   :  { %s55_s29 = sshll.u32 %s699_s28, 4  ;;  %s700_s30 = smov 512   ;;  %s56_s29 = int_to_ptr.vmem [resolvable:$true] %s55_s29 }
   0x8   :  { %s701_s6 = smov 32   ;;  %s19_s8 = sshll.u32 %s764_s0, 4  ;;  %s20_s8 = int_to_ptr.hbm [resolvable:$true] %s19_s8 }
   0x9   :  { %61 = dma.hbm_to_vmem [thread:$0]  %s54_s25, 16384, %s56_s29, [#allocation9], %s700_s30, %s700_s30, %s701_s6  }
   0xa   :  { %s702_s9 = smov [#allocation2]   ;;  %s43_s12 = sshll.u32 %s766_s2, 4  ;;  %s44_s12 = int_to_ptr.hbm [resolvable:$true] %s43_s12 }
   0xb   :  { %s21_s10 = sshll.u32 %s702_s9, 4  ;;  %s703_s13 = smov [#allocation7]   ;;  %s22_s10 = int_to_ptr.vmem [resolvable:$true] %s21_s10 }
   0xc   :  { %24 = dma.hbm_to_vmem [thread:$0]  %s20_s8, 64, %s22_s10, [#allocation3]  }
   0xd   :  { %s45_s14 = sshll.u32 %s703_s13, 4  ;;  %s67_s17 = sshll.u32 %s768_s4, 4  ;;  %s46_s14 = int_to_ptr.vmem [resolvable:$true] %s45_s14  ;;  %s68_s17 = int_to_ptr.hbm [resolvable:$true] %s67_s17 }
   0xe   :  { %48 = dma.hbm_to_vmem [thread:$0]  %s44_s12, 32, %s46_s14, [#allocation6]  }
   0xf   :  { %s704_s0 = smov [#allocation10]  }
  0x10   :  { %s69_s18 = sshll.u32 %s704_s0, 4  ;;  %s70_s18 = int_to_ptr.vmem [resolvable:$true] %s69_s18 }
  0x11   :  { %72 = dma.hbm_to_vmem [thread:$0]  %s68_s17, 64, %s70_s18, [#allocation9]  }
  0x12   :  { %688 = dma.done.wait [#allocation3], 64  }
  0x13   :  { %689 = vsyncadd [#allocation3], 4294967232 }
  0x14   :  { %690 = dma.done.wait [#allocation6], 4128  }
  0x15   :  { %691 = vsyncadd [#allocation6], 4294963168 }
  0x16   :  { %692 = dma.done.wait [#allocation9], 16448  }
  0x17   :  { %693 = vsyncadd [#allocation9], 4294950848  ;;  %v124_v0 = vld [vmem:[#allocation5 + $0xf0] sm:$0xff]  ;;  %v125_v1 = vld [vmem:[#allocation5 + $0xf8] sm:$0xff]  ;;  %vm500_vm0 = vcmask 1043456   ;;  %s705_s2 = smov [#allocation11]  }
  0x18   :  { %v122_v2 = vld [vmem:[#allocation5 + $0xe0] sm:$0xff]  ;;  %132 = vmatpush.msra.mxu0 %v124_v0  ;;  %152 = vmatpush.msra.mxu1 %v125_v1  ;;  %v123_v3 = vld [vmem:[#allocation5 + $0xe8] sm:$0xff]  ;;  %v120_v4 = vld [vmem:[#allocation5 + $0xd0] sm:$0xff]  ;;  %s512_s4 = sshll.u32 %s705_s2, 4  ;;  %s514_s21 = sshll.u32 %s769_s5, 4  ;;  %s513_s4 = int_to_ptr.vmem [resolvable:$true] %s512_s4  ;;  %s515_s21 = int_to_ptr.hbm [resolvable:$true] %s514_s21 }
  0x19   :  { %v121_v5 = vld [vmem:[#allocation5 + $0xd8] sm:$0xff]  ;;  %v118_v6 = vld [vmem:[#allocation5 + $0xc0] sm:$0xff]  ;;  %v119_v7 = vld [vmem:[#allocation5 + $0xc8] sm:$0xff] }
  0x1a   :  { %133 = vmatpush.msra.mxu0 %v122_v2  ;;  %153 = vmatpush.msra.mxu1 %v123_v3  ;;  %v116_v8 = vld [vmem:[#allocation5 + $0xb0] sm:$0xff]  ;;  %v117_v9 = vld [vmem:[#allocation5 + $0xb8] sm:$0xff]  ;;  %v114_v10 = vld [vmem:[#allocation5 + $0xa0] sm:$0xff] }
  0x1b   :  { %v115_v11 = vld [vmem:[#allocation5 + $0xa8] sm:$0xff]  ;;  %v112_v12 = vld [vmem:[#allocation5 + $0x90] sm:$0xff]  ;;  %v113_v13 = vld [vmem:[#allocation5 + $0x98] sm:$0xff] }
  0x1c   :  { %134 = vmatpush.msra.mxu0 %v120_v4  ;;  %154 = vmatpush.msra.mxu1 %v121_v5  ;;  %v110_v14 = vld [vmem:[#allocation5 + $0x80] sm:$0xff]  ;;  %v111_v17 = vld [vmem:[#allocation5 + $0x88] sm:$0xff]  ;;  %v108_v21 = vld [vmem:[#allocation5 + $0x70] sm:$0xff] }
  0x1d   :  { %v256_v15 = vld [vmem:[#allocation8 + $0x1e0] sm:$0xff]  ;;  %v109_v22 = vld [vmem:[#allocation5 + $0x78] sm:$0xff]  ;;  %v104_v30 = vld [vmem:[#allocation5 + $0x50] sm:$0xff] }
  0x1e   :  { %135 = vmatpush.msra.mxu0 %v118_v6  ;;  %155 = vmatpush.msra.mxu1 %v119_v7  ;;  %v320_v16 = vld [vmem:[#allocation8 + $0x3e0] sm:$0xff]  ;;  %v105_v31 = vld [vmem:[#allocation5 + $0x58] sm:$0xff]  ;;  %v100_v38 = vld [vmem:[#allocation5 + $0x30] sm:$0xff] }
  0x1f   :  { %334 = vmatpush.msra.mxu2 %v256_v15  ;;  %354 = vmatpush.msra.mxu3 %v320_v16  ;;  %v252_v18 = vld [vmem:[#allocation8 + $0x1c0] sm:$0xff]  ;;  %v101_v39 = vld [vmem:[#allocation5 + $0x38] sm:$0xff]  ;;  %v96_v46 = vld [vmem:[#allocation5 + $0x10] sm:$0xff] }
  0x20   :  { %136 = vmatpush.msra.mxu0 %v116_v8  ;;  %156 = vmatpush.msra.mxu1 %v117_v9  ;;  %v316_v19 = vld [vmem:[#allocation8 + $0x3c0] sm:$0xff]  ;;  %v97_v47 = vld [vmem:[#allocation5 + $0x18] sm:$0xff]  ;;  %v257_v51 = vld [vmem:[#allocation8 + $0x1e8] sm:$0xff] }
  0x21   :  { %v248_v20 = vld [vmem:[#allocation8 + $0x1a0] sm:$0xff]  ;;  %335 = vmatpush.msra.mxu2 %v252_v18  ;;  %355 = vmatpush.msra.mxu3 %v316_v19  ;;  %v93_v50 = vld [vmem:[#allocation2] sm:$0xf]  ;;  %v321_v52 = vld [vmem:[#allocation8 + $0x3e8] sm:$0xff] }
  0x22   :  { %137 = vmatpush.msra.mxu0 %v114_v10  ;;  %157 = vmatpush.msra.mxu1 %v115_v11  ;;  %v312_v23 = vld [vmem:[#allocation8 + $0x3a0] sm:$0xff]  ;;  %v253_v53 = vld [vmem:[#allocation8 + $0x1c8] sm:$0xff] }
  0x23   :  { %v244_v24 = vld [vmem:[#allocation8 + $0x180] sm:$0xff]  ;;  %336 = vmatpush.msra.mxu2 %v248_v20  ;;  %356 = vmatpush.msra.mxu3 %v312_v23  ;;  %v317_v54 = vld [vmem:[#allocation8 + $0x3c8] sm:$0xff] }
  0x24   :  { %138 = vmatpush.msra.mxu0 %v112_v12  ;;  %158 = vmatpush.msra.mxu1 %v113_v13  ;;  %v308_v25 = vld [vmem:[#allocation8 + $0x380] sm:$0xff]  ;;  %v249_v55 = vld [vmem:[#allocation8 + $0x1a8] sm:$0xff] }
  0x25   :  { %v106_v26 = vld [vmem:[#allocation5 + $0x60] sm:$0xff]  ;;  %v107_v27 = vld [vmem:[#allocation5 + $0x68] sm:$0xff]  ;;  %337 = vmatpush.msra.mxu2 %v244_v24  ;;  %357 = vmatpush.msra.mxu3 %v308_v25 }
  0x26   :  { %139 = vmatpush.msra.mxu0 %v110_v14  ;;  %159 = vmatpush.msra.mxu1 %v111_v17  ;;  %v240_v28 = vld [vmem:[#allocation8 + $0x160] sm:$0xff]  ;;  %v313_v56 = vld [vmem:[#allocation8 + $0x3a8] sm:$0xff] }
  0x27   :  { %v304_v29 = vld [vmem:[#allocation8 + $0x360] sm:$0xff]  ;;  %338 = vmatpush.msra.mxu2 %v240_v28  ;;  %v245_v57 = vld [vmem:[#allocation8 + $0x188] sm:$0xff] }
  0x28   :  { %140 = vmatpush.msra.mxu0 %v108_v21  ;;  %160 = vmatpush.msra.mxu1 %v109_v22  ;;  %v236_v32 = vld [vmem:[#allocation8 + $0x140] sm:$0xff]  ;;  %v309_v58 = vld [vmem:[#allocation8 + $0x388] sm:$0xff] }
  0x29   :  { %v300_v33 = vld [vmem:[#allocation8 + $0x340] sm:$0xff]  ;;  %358 = vmatpush.msra.mxu3 %v304_v29  ;;  %339 = vmatpush.msra.mxu2 %v236_v32  ;;  %v241_v59 = vld [vmem:[#allocation8 + $0x168] sm:$0xff] }
  0x2a   :  { %141 = vmatpush.msra.mxu0 %v106_v26  ;;  %161 = vmatpush.msra.mxu1 %v107_v27  ;;  %v102_v34 = vld [vmem:[#allocation5 + $0x40] sm:$0xff]  ;;  %v103_v35 = vld [vmem:[#allocation5 + $0x48] sm:$0xff] }
  0x2b   :  { %v232_v36 = vld [vmem:[#allocation8 + $0x120] sm:$0xff]  ;;  %359 = vmatpush.msra.mxu3 %v300_v33  ;;  %v305_v60 = vld [vmem:[#allocation8 + $0x368] sm:$0xff]  ;;  %v258_v33 = vld [vmem:[#allocation8 + $0x1f0] sm:$0xff] }
  0x2c   :  { %142 = vmatpush.msra.mxu0 %v104_v30  ;;  %162 = vmatpush.msra.mxu1 %v105_v31  ;;  %v296_v37 = vld [vmem:[#allocation8 + $0x320] sm:$0xff]  ;;  %v237_v61 = vld [vmem:[#allocation8 + $0x148] sm:$0xff] }
  0x2d   :  { %v228_v40 = vld [vmem:[#allocation8 + $0x100] sm:$0xff]  ;;  %340 = vmatpush.msra.mxu2 %v232_v36  ;;  %360 = vmatpush.msra.mxu3 %v296_v37  ;;  %v301_v62 = vld [vmem:[#allocation8 + $0x348] sm:$0xff]  ;;  %v323_v36 = vld [vmem:[#allocation8 + $0x3f8] sm:$0xff] }
  0x2e   :  { %143 = vmatpush.msra.mxu0 %v102_v34  ;;  %163 = vmatpush.msra.mxu1 %v103_v35  ;;  %v292_v41 = vld [vmem:[#allocation8 + $0x300] sm:$0xff]  ;;  %v233_v63 = vld [vmem:[#allocation8 + $0x128] sm:$0xff]  ;;  %v322_v34 = vld [vmem:[#allocation8 + $0x3f0] sm:$0xff] }
  0x2f   :  { %v98_v42 = vld [vmem:[#allocation5 + $0x20] sm:$0xff]  ;;  %v99_v43 = vld [vmem:[#allocation5 + $0x28] sm:$0xff]  ;;  %341 = vmatpush.msra.mxu2 %v228_v40  ;;  %361 = vmatpush.msra.mxu3 %v292_v41  ;;  %v254_v37 = vld [vmem:[#allocation8 + $0x1d0] sm:$0xff] }
  0x30   :  { %144 = vmatpush.msra.mxu0 %v100_v38  ;;  %164 = vmatpush.msra.mxu1 %v101_v39  ;;  %v224_v44 = vld [vmem:[#allocation8 + $0xe0] sm:$0xff]  ;;  %v297_v0 = vld [vmem:[#allocation8 + $0x328] sm:$0xff]  ;;  %v259_v35 = vld [vmem:[#allocation8 + $0x1f8] sm:$0xff] }
  0x31   :  { %v288_v45 = vld [vmem:[#allocation8 + $0x2e0] sm:$0xff]  ;;  %342 = vmatpush.msra.mxu2 %v224_v44  ;;  %v229_v1 = vld [vmem:[#allocation8 + $0x108] sm:$0xff]  ;;  %v318_v38 = vld [vmem:[#allocation8 + $0x3d0] sm:$0xff] }
  0x32   :  { %145 = vmatpush.msra.mxu0 %v98_v42  ;;  %165 = vmatpush.msra.mxu1 %v99_v43  ;;  %v94_v48 = vld [vmem:[#allocation5] sm:$0xff]  ;;  %v95_v49 = vld [vmem:[#allocation5 + $0x8] sm:$0xff]  ;;  %v250_v41 = vld [vmem:[#allocation8 + $0x1b0] sm:$0xff] }
  0x33   :  { %362 = vmatpush.msra.mxu3 %v288_v45  ;;  %v293_v2 = vld [vmem:[#allocation8 + $0x308] sm:$0xff]  ;;  %v220_v5 = vld [vmem:[#allocation8 + $0xc0] sm:$0xff]  ;;  %v255_v39 = vld [vmem:[#allocation8 + $0x1d8] sm:$0xff] }
  0x34   :  { %146 = vmatpush.msra.mxu0 %v96_v46  ;;  %166 = vmatpush.msra.mxu1 %v97_v47  ;;  %v225_v3 = vld [vmem:[#allocation8 + $0xe8] sm:$0xff]  ;;  %v284_v6 = vld [vmem:[#allocation8 + $0x2c0] sm:$0xff]  ;;  %v319_v40 = vld [vmem:[#allocation8 + $0x3d8] sm:$0xff] }
  0x35   :  { %v289_v4 = vld [vmem:[#allocation8 + $0x2e8] sm:$0xff]  ;;  %343 = vmatpush.msra.mxu2 %v220_v5  ;;  %363 = vmatpush.msra.mxu3 %v284_v6  ;;  %v216_v9 = vld [vmem:[#allocation8 + $0xa0] sm:$0xff]  ;;  %v314_v42 = vld [vmem:[#allocation8 + $0x3b0] sm:$0xff] }
  0x36   :  { %147 = vmatpush.msra.mxu0 %v94_v48  ;;  %167 = vmatpush.msra.mxu1 %v95_v49  ;;  %v221_v7 = vld [vmem:[#allocation8 + $0xc8] sm:$0xff]  ;;  %v280_v10 = vld [vmem:[#allocation8 + $0x2a0] sm:$0xff]  ;;  %v251_v43 = vld [vmem:[#allocation8 + $0x1b8] sm:$0xff] }
  0x37   :  { %148 = vmatmul.f32.vlgmr.msra.gmra.mxu0 %v93_v50  ;;  %168 = vmatmul.f32.vlgmr.msra.gmra.mxu1 %v93_v50  ;;  %v285_v8 = vld [vmem:[#allocation8 + $0x2c8] sm:$0xff]  ;;  %v212_v13 = vld [vmem:[#allocation8 + $0x80] sm:$0xff]  ;;  %v315_v44 = vld [vmem:[#allocation8 + $0x3b8] sm:$0xff] }
  0x38   :  { %374 = vmatpush.msrb.mxu0 %v257_v51  ;;  %394 = vmatpush.msrb.mxu1 %v321_v52  ;;  %v217_v11 = vld [vmem:[#allocation8 + $0xa8] sm:$0xff]  ;;  %v276_v14 = vld [vmem:[#allocation8 + $0x280] sm:$0xff]  ;;  %v246_v45 = vld [vmem:[#allocation8 + $0x190] sm:$0xff] }
  0x39   :  { %344 = vmatpush.msra.mxu2 %v216_v9  ;;  %364 = vmatpush.msra.mxu3 %v280_v10  ;;  %v281_v12 = vld [vmem:[#allocation8 + $0x2a8] sm:$0xff]  ;;  %v208_v17 = vld [vmem:[#allocation8 + $0x60] sm:$0xff]  ;;  %v310_v46 = vld [vmem:[#allocation8 + $0x390] sm:$0xff] }
  0x3a   :  { %375 = vmatpush.msrb.mxu0 %v253_v53  ;;  %395 = vmatpush.msrb.mxu1 %v317_v54  ;;  %v213_v15 = vld [vmem:[#allocation8 + $0x88] sm:$0xff]  ;;  %v272_v18 = vld [vmem:[#allocation8 + $0x260] sm:$0xff]  ;;  %v247_v47 = vld [vmem:[#allocation8 + $0x198] sm:$0xff] }
  0x3b   :  { %345 = vmatpush.msra.mxu2 %v212_v13  ;;  %365 = vmatpush.msra.mxu3 %v276_v14  ;;  %v277_v16 = vld [vmem:[#allocation8 + $0x288] sm:$0xff]  ;;  %v204_v21 = vld [vmem:[#allocation8 + $0x40] sm:$0xff]  ;;  %v311_v48 = vld [vmem:[#allocation8 + $0x398] sm:$0xff] }
  0x3c   :  { %376 = vmatpush.msrb.mxu0 %v249_v55  ;;  %396 = vmatpush.msrb.mxu1 %v313_v56  ;;  %v209_v19 = vld [vmem:[#allocation8 + $0x68] sm:$0xff]  ;;  %v268_v22 = vld [vmem:[#allocation8 + $0x240] sm:$0xff]  ;;  %v242_v49 = vld [vmem:[#allocation8 + $0x170] sm:$0xff] }
  0x3d   :  { %346 = vmatpush.msra.mxu2 %v208_v17  ;;  %366 = vmatpush.msra.mxu3 %v272_v18  ;;  %v273_v20 = vld [vmem:[#allocation8 + $0x268] sm:$0xff]  ;;  %v200_v25 = vld [vmem:[#allocation8 + $0x20] sm:$0xff]  ;;  %v306_v50 = vld [vmem:[#allocation8 + $0x370] sm:$0xff] }
  0x3e   :  { %377 = vmatpush.msrb.mxu0 %v245_v57  ;;  %397 = vmatpush.msrb.mxu1 %v309_v58  ;;  %v205_v23 = vld [vmem:[#allocation8 + $0x48] sm:$0xff]  ;;  %v264_v26 = vld [vmem:[#allocation8 + $0x220] sm:$0xff]  ;;  %v243_v51 = vld [vmem:[#allocation8 + $0x178] sm:$0xff] }
  0x3f   :  { %347 = vmatpush.msra.mxu2 %v204_v21  ;;  %367 = vmatpush.msra.mxu3 %v268_v22  ;;  %v269_v24 = vld [vmem:[#allocation8 + $0x248] sm:$0xff]  ;;  %v196_v29 = vld [vmem:[#allocation8] sm:$0xff]  ;;  %v307_v52 = vld [vmem:[#allocation8 + $0x378] sm:$0xff] }
  0x40   :  { %378 = vmatpush.msrb.mxu0 %v241_v59  ;;  %398 = vmatpush.msrb.mxu1 %v305_v60  ;;  %v201_v27 = vld [vmem:[#allocation8 + $0x28] sm:$0xff]  ;;  %v260_v30 = vld [vmem:[#allocation8 + $0x200] sm:$0xff]  ;;  %v238_v53 = vld [vmem:[#allocation8 + $0x150] sm:$0xff] }
  0x41   :  { %348 = vmatpush.msra.mxu2 %v200_v25  ;;  %368 = vmatpush.msra.mxu3 %v264_v26  ;;  %v265_v28 = vld [vmem:[#allocation8 + $0x228] sm:$0xff]  ;;  %v302_v54 = vld [vmem:[#allocation8 + $0x350] sm:$0xff]  ;;  %v239_v55 = vld [vmem:[#allocation8 + $0x158] sm:$0xff] }
  0x42   :  { %379 = vmatpush.msrb.mxu0 %v237_v61  ;;  %399 = vmatpush.msrb.mxu1 %v301_v62  ;;  %v197_v31 = vld [vmem:[#allocation8 + $0x8] sm:$0xff]  ;;  %v126_v56 = vld [vmem:[#allocation7] sm:$0x3]  ;;  %v234_v58 = vld [vmem:[#allocation8 + $0x130] sm:$0xff] }
  0x43   :  { %349 = vmatpush.msra.mxu2 %v196_v29  ;;  %369 = vmatpush.msra.mxu3 %v260_v30  ;;  %v261_v32 = vld [vmem:[#allocation8 + $0x208] sm:$0xff]  ;;  %v303_v57 = vld [vmem:[#allocation8 + $0x358] sm:$0xff]  ;;  %v298_v59 = vld [vmem:[#allocation8 + $0x330] sm:$0xff] }
  0x44   :  { %380 = vmatpush.msrb.mxu0 %v233_v63  ;;  %400 = vmatpush.msrb.mxu1 %v297_v0  ;;  %v235_v60 = vld [vmem:[#allocation8 + $0x138] sm:$0xff]  ;;  %v230_v62 = vld [vmem:[#allocation8 + $0x110] sm:$0xff] }
  0x45   :  { %414 = vmatpush.msrb.mxu2 %v258_v33  ;;  %434 = vmatpush.msrb.mxu3 %v322_v34  ;;  %v299_v61 = vld [vmem:[#allocation8 + $0x338] sm:$0xff]  ;;  %v294_v63 = vld [vmem:[#allocation8 + $0x310] sm:$0xff] }
  0x46   :  { %381 = vmatpush.msrb.mxu0 %v229_v1  ;;  %401 = vmatpush.msrb.mxu1 %v293_v2  ;;  %v231_v0 = vld [vmem:[#allocation8 + $0x118] sm:$0xff]  ;;  %v128_v1 = vperm.slane %v126_v56, 0  ;;  %v129_v2 = vperm.slane %v126_v56, 1  ;;  %v290_v5 = vld [vmem:[#allocation8 + $0x2f0] sm:$0xff] }
  0x47   :  { %415 = vmatpush.msrb.mxu2 %v254_v37  ;;  %435 = vmatpush.msrb.mxu3 %v318_v38  ;;  %v227_v6 = vld [vmem:[#allocation8 + $0xf8] sm:$0xff]  ;;  %v222_v10 = vld [vmem:[#allocation8 + $0xd0] sm:$0xff] }
  0x48   :  { %382 = vmatpush.msrb.mxu0 %v225_v3  ;;  %402 = vmatpush.msrb.mxu1 %v289_v4  ;;  %v295_v3 = vld [vmem:[#allocation8 + $0x318] sm:$0xff]  ;;  %v226_v4 = vld [vmem:[#allocation8 + $0xf0] sm:$0xff] }
  0x49   :  { %416 = vmatpush.msrb.mxu2 %v250_v41  ;;  %436 = vmatpush.msrb.mxu3 %v314_v42  ;;  %v282_v17 = vld [vmem:[#allocation8 + $0x2b0] sm:$0xff]  ;;  %v219_v18 = vld [vmem:[#allocation8 + $0xb8] sm:$0xff] }
  0x4a   :  { %383 = vmatpush.msrb.mxu0 %v221_v7  ;;  %403 = vmatpush.msrb.mxu1 %v285_v8  ;;  %v291_v7 = vld [vmem:[#allocation8 + $0x2f8] sm:$0xff]  ;;  %v214_v22 = vld [vmem:[#allocation8 + $0x90] sm:$0xff] }
  0x4b   :  { %417 = vmatpush.msrb.mxu2 %v246_v45  ;;  %437 = vmatpush.msrb.mxu3 %v310_v46  ;;  %v283_v21 = vld [vmem:[#allocation8 + $0x2b8] sm:$0xff]  ;;  %v274_v29 = vld [vmem:[#allocation8 + $0x270] sm:$0xff] }
  0x4c   :  { %384 = vmatpush.msrb.mxu0 %v217_v11  ;;  %404 = vmatpush.msrb.mxu1 %v281_v12  ;;  %v286_v11 = vld [vmem:[#allocation8 + $0x2d0] sm:$0xff]  ;;  %v223_v12 = vld [vmem:[#allocation8 + $0xd8] sm:$0xff] }
  0x4d   :  { %418 = vmatpush.msrb.mxu2 %v242_v49  ;;  %438 = vmatpush.msrb.mxu3 %v306_v50  ;;  %v211_v30 = vld [vmem:[#allocation8 + $0x78] sm:$0xff]  ;;  %v270_v33 = vld [vmem:[#allocation8 + $0x250] sm:$0xff] }
  0x4e   :  { %385 = vmatpush.msrb.mxu0 %v213_v15  ;;  %405 = vmatpush.msrb.mxu1 %v277_v16  ;;  %v287_v15 = vld [vmem:[#allocation8 + $0x2d8] sm:$0xff]  ;;  %v218_v16 = vld [vmem:[#allocation8 + $0xb0] sm:$0xff] }
  0x4f   :  { %419 = vmatpush.msrb.mxu2 %v238_v53  ;;  %439 = vmatpush.msrb.mxu3 %v302_v54  ;;  %v207_v34 = vld [vmem:[#allocation8 + $0x58] sm:$0xff]  ;;  %v266_v37 = vld [vmem:[#allocation8 + $0x230] sm:$0xff] }
  0x50   :  { %386 = vmatpush.msrb.mxu0 %v209_v19  ;;  %406 = vmatpush.msrb.mxu1 %v273_v20  ;;  %v203_v38 = vld [vmem:[#allocation8 + $0x38] sm:$0xff]  ;;  %v262_v41 = vld [vmem:[#allocation8 + $0x210] sm:$0xff] }
  0x51   :  { %420 = vmatpush.msrb.mxu2 %v234_v58  ;;  %440 = vmatpush.msrb.mxu3 %v298_v59  ;;  %v199_v42 = vld [vmem:[#allocation8 + $0x18] sm:$0xff] }
  0x52   :  { %387 = vmatpush.msrb.mxu0 %v205_v23  ;;  %407 = vmatpush.msrb.mxu1 %v269_v24  ;;  %v278_v23 = vld [vmem:[#allocation8 + $0x290] sm:$0xff]  ;;  %v215_v24 = vld [vmem:[#allocation8 + $0x98] sm:$0xff] }
  0x53   :  { %421 = vmatpush.msrb.mxu2 %v230_v62  ;;  %441 = vmatpush.msrb.mxu3 %v294_v63 }
  0x54   :  { %388 = vmatpush.msrb.mxu0 %v201_v27  ;;  %408 = vmatpush.msrb.mxu1 %v265_v28  ;;  %v279_v27 = vld [vmem:[#allocation8 + $0x298] sm:$0xff]  ;;  %v210_v28 = vld [vmem:[#allocation8 + $0x70] sm:$0xff] }
  0x55   :  { %422 = vmatpush.msrb.mxu2 %v226_v4  ;;  %442 = vmatpush.msrb.mxu3 %v290_v5 }
  0x56   :  { %389 = vmatpush.msrb.mxu0 %v197_v31  ;;  %409 = vmatpush.msrb.mxu1 %v261_v32  ;;  %v275_v31 = vld [vmem:[#allocation8 + $0x278] sm:$0xff]  ;;  %v206_v32 = vld [vmem:[#allocation8 + $0x50] sm:$0xff] }
  0x57   :  { %423 = vmatpush.msrb.mxu2 %v222_v10  ;;  %443 = vmatpush.msrb.mxu3 %v286_v11 }
  0x58   :  { %454 = vmatpush.msra.mxu0 %v259_v35  ;;  %474 = vmatpush.msra.mxu1 %v323_v36  ;;  %v271_v35 = vld [vmem:[#allocation8 + $0x258] sm:$0xff]  ;;  %v202_v36 = vld [vmem:[#allocation8 + $0x30] sm:$0xff] }
  0x59   :  { %424 = vmatpush.msrb.mxu2 %v218_v16  ;;  %444 = vmatpush.msrb.mxu3 %v282_v17 }
  0x5a   :  { %455 = vmatpush.msra.mxu0 %v255_v39  ;;  %475 = vmatpush.msra.mxu1 %v319_v40  ;;  %v267_v39 = vld [vmem:[#allocation8 + $0x238] sm:$0xff]  ;;  %v198_v40 = vld [vmem:[#allocation8 + $0x10] sm:$0xff] }
  0x5b   :  { %425 = vmatpush.msrb.mxu2 %v214_v22  ;;  %445 = vmatpush.msrb.mxu3 %v278_v23 }
  0x5c   :  { %456 = vmatpush.msra.mxu0 %v251_v43  ;;  %476 = vmatpush.msra.mxu1 %v315_v44  ;;  %v263_v43 = vld [vmem:[#allocation8 + $0x218] sm:$0xff] }
  0x5d   :  { %426 = vmatpush.msrb.mxu2 %v210_v28  ;;  %446 = vmatpush.msrb.mxu3 %v274_v29 }
  0x5e   :  { %457 = vmatpush.msra.mxu0 %v247_v47  ;;  %477 = vmatpush.msra.mxu1 %v311_v48 }
  0x5f   :  { %427 = vmatpush.msrb.mxu2 %v206_v32  ;;  %447 = vmatpush.msrb.mxu3 %v270_v33 }
  0x60   :  { %458 = vmatpush.msra.mxu0 %v243_v51  ;;  %478 = vmatpush.msra.mxu1 %v307_v52 }
  0x61   :  { %428 = vmatpush.msrb.mxu2 %v202_v36  ;;  %448 = vmatpush.msrb.mxu3 %v266_v37 }
  0x62   :  { %459 = vmatpush.msra.mxu0 %v239_v55  ;;  %479 = vmatpush.msra.mxu1 %v303_v57 }
  0x63   :  { %429 = vmatpush.msrb.mxu2 %v198_v40  ;;  %449 = vmatpush.msrb.mxu3 %v262_v41 }
  0x64   :  { %460 = vmatpush.msra.mxu0 %v235_v60  ;;  %480 = vmatpush.msra.mxu1 %v299_v61 }
  0x66   :  { %461 = vmatpush.msra.mxu0 %v231_v0  ;;  %481 = vmatpush.msra.mxu1 %v295_v3  ;;  %v324_v0 = vld [vmem:[#allocation10] sm:$0xf] }
  0x67   :  { %v326_v5 = vperm.slane %v324_v0, 0  ;;  %v328_v16 = vperm.slane %v324_v0, 2 }
  0x68   :  { %462 = vmatpush.msra.mxu0 %v227_v6  ;;  %482 = vmatpush.msra.mxu1 %v291_v7  ;;  %v329_v7 = vperm.slane %v324_v0, 3 }
  0x6a   :  { %463 = vmatpush.msra.mxu0 %v223_v12  ;;  %483 = vmatpush.msra.mxu1 %v287_v15 }
  0x6c   :  { %464 = vmatpush.msra.mxu0 %v219_v18  ;;  %484 = vmatpush.msra.mxu1 %v283_v21 }
  0x6e   :  { %465 = vmatpush.msra.mxu0 %v215_v24  ;;  %485 = vmatpush.msra.mxu1 %v279_v27 }
  0x70   :  { %466 = vmatpush.msra.mxu0 %v211_v30  ;;  %486 = vmatpush.msra.mxu1 %v275_v31 }
  0x72   :  { %467 = vmatpush.msra.mxu0 %v207_v34  ;;  %487 = vmatpush.msra.mxu1 %v271_v35 }
  0x74   :  { %468 = vmatpush.msra.mxu0 %v203_v38  ;;  %488 = vmatpush.msra.mxu1 %v267_v39 }
  0x76   :  { %469 = vmatpush.msra.mxu0 %v199_v42  ;;  %489 = vmatpush.msra.mxu1 %v263_v43 }
  0xb4   :  { %v149_v8 = vpop.f32.mrf.mxu0  ;;  %v169_v9 = vpop.f32.mrf.mxu1 }
  0xb5   :  { %v751_v13 = vadd.f32 %v149_v8, %v128_v1  ;;  %v753_v14 = vadd.f32 %v169_v9, %v129_v2  ;;  %v327_v1 = vperm.slane %v324_v0, 1 }
  0xb7   :  { %v172_v19 = vmin.f32 %v751_v13, 20.0  ;;  %v173_v20 = vmin.f32 %v753_v14, 20.0 }
  0xb9   :  { %v174_v25 = vmul.f32 1.442695, %v172_v19  ;;  %v176_v26 = vmul.f32 1.442695, %v173_v20 }
  0xbb   :  { %536 = vpow2.f32 %v174_v25 }
  0xbc   :  { %538 = vpow2.f32 %v176_v26 }
  0xc1   :  { %v537_v44 = vpop.eup %536 }
  0xc2   :  { %v539_v45 = vpop.eup %538  ;;  %v178_v46 = vadd.f32 2.0, %v537_v44 }
  0xc3   :  { %v179_v47 = vadd.f32 2.0, %v539_v45 }
  0xc4   :  { %v180_v48 = vmul.f32 %v537_v44, %v178_v46 }
  0xc5   :  { %v181_v49 = vmul.f32 %v539_v45, %v179_v47 }
  0xc6   :  { %v182_v50 = vadd.f32 2.0, %v180_v48 }
  0xc7   :  { %v183_v51 = vadd.f32 2.0, %v181_v49 }
  0xc8   :  { %540 = vrcp.f32 %v182_v50 }
  0xc9   :  { %542 = vrcp.f32 %v183_v51 }
  0xce   :  { %v541_v52 = vpop.eup %540 }
  0xcf   :  { %v543_v53 = vpop.eup %542  ;;  %v186_v54 = vmul.f32 %v541_v52, %v182_v50 }
  0xd0   :  { %v187_v55 = vmul.f32 %v543_v53, %v183_v51 }
  0xd1   :  { %v188_v56 = vsub.f32 2.0, %v186_v54 }
  0xd2   :  { %v189_v57 = vsub.f32 2.0, %v187_v55 }
  0xd3   :  { %v190_v58 = vmul.f32 %v541_v52, %v188_v56 }
  0xd4   :  { %v191_v59 = vmul.f32 %v543_v53, %v189_v57 }
  0xd5   :  { %v192_v60 = vmul.f32 %v190_v58, %v180_v48 }
  0xd6   :  { %v193_v61 = vmul.f32 %v191_v59, %v181_v49 }
  0xd7   :  { %v194_v62 = vmul.f32 %v192_v60, %v751_v13 }
  0xd8   :  { %v195_v63 = vmul.f32 %v193_v61, %v753_v14 }
  0xd9   :  { %350 = vmatmul.f32.vlgmr.msra.gmra.mxu2 %v194_v62  ;;  %390 = vmatmul.f32.vlgmr.msrb.gmra.mxu0 %v194_v62 }
  0xda   :  { %370 = vmatmul.f32.vlgmr.msra.gmra.mxu3 %v195_v63  ;;  %410 = vmatmul.f32.vlgmr.msrb.gmra.mxu1 %v195_v63 }
  0xe1   :  { %430 = vmatmul.f32.vlgmr.msrb.gmra.mxu2 %v194_v62  ;;  %470 = vmatmul.f32.vlgmr.msra.gmra.mxu0 %v194_v62 }
  0xe2   :  { %450 = vmatmul.f32.vlgmr.msrb.gmra.mxu3 %v195_v63  ;;  %490 = vmatmul.f32.vlgmr.msra.gmra.mxu1 %v195_v63 }
 0x156   :  { %v391_v2 = vpop.f32.mrf.mxu0 }
 0x157   :  { %v392_v3 = vadd.f32 %v391_v2, %v327_v1  ;;  %v411_v4 = vpop.f32.mrf.mxu1 }
 0x159   :  { %v412_v6 = vadd.f32 %v411_v4, %v392_v3 }
 0x15b   :  { %v498_v12 = vrot.slane %v412_v6, 4 }
 0x15c   :  { %v351_v8 = vpop.f32.mrf.mxu2 }
 0x15d   :  { %v352_v9 = vadd.f32 %v351_v8, %v326_v5  ;;  %v371_v10 = vpop.f32.mrf.mxu3 }
 0x15e   :  { %v471_v11 = vpop.f32.mrf.mxu0 }
 0x15f   :  { %v372_v13 = vadd.f32 %v371_v10, %v352_v9  ;;  %v472_v14 = vadd.f32 %v471_v11, %v329_v7  ;;  %v491_v17 = vpop.f32.mrf.mxu1 }
 0x161   :  { %v501_v15 = vsel %vm500_vm0, %v372_v13, %v498_v12  ;;  %v492_v18 = vadd.f32 %v491_v17, %v472_v14 }
 0x162   :  { %505 = vst [vmem:[#allocation11] sm:$0xff] %v501_v15 }
 0x163   :  { %v499_v22 = vrot.slane %v492_v18, 4 }
 0x164   :  { %v431_v19 = vpop.f32.mrf.mxu2 }
 0x165   :  { %v432_v20 = vadd.f32 %v431_v19, %v328_v16  ;;  %v451_v21 = vpop.f32.mrf.mxu3 }
 0x167   :  { %v452_v23 = vadd.f32 %v451_v21, %v432_v20 }
 0x169   :  { %v502_v24 = vsel %vm500_vm0, %v452_v23, %v499_v22 }
 0x16a   :  { %506 = vst [vmem:[#allocation11 + $0x8] sm:$0xff] %v502_v24 }
 0x16b   :  { %517 = dma.vmem_to_hbm [thread:$0]  %s513_s4, 256, %s515_s21, [#allocation4]  }
 0x16c   :  { %694 = dma.done.wait [#allocation4], 256  }
 0x16d   :  { %695 = vsyncadd [#allocation4], 4294967040 }
 0x16e   :  { %522 = vsyncpa [#allocation3], 1 }
 0x16f   :  { %523 = vsyncpa [#allocation6], 1 }
 0x170   :  { %524 = vsyncpa [#allocation9], 1 }
 0x171   :  { %525 = vsyncpa [#allocation4], 1 }

</bundles_post_ra>
